<compile_context>
chip_gen: v6e
topology: v6e:2x2x1
jax: 0.10.0
libtpu: 0.0.40
codegen_flags: <defaults>
</compile_context>

<pallas_src>
import jax
import jax.numpy as jnp
from jax import lax
from jax.experimental import pallas as pl
from jax.experimental.pallas import tpu as pltpu


def rnn_kernel(x_ref, h0_ref, wx_ref, wh_ref, bi_ref, wo_ref, bo_ref,
               out_ref, hT_ref):
    Bp = h0_ref.shape[0]          # sublane-padded batch
    S = x_ref.shape[0] // Bp      # static

    # ---- Input projection for ALL timesteps in one MXU pass (off the serial
    # chain): xW = x_flat @ Wx^T + b_i2h, shape (S*Bp, H), f32 accumulation.
    xw = (jnp.dot(x_ref[...], wx_ref[...], preferred_element_type=jnp.float32)
          + bi_ref[...])

    wh = wh_ref[...]                                # (H, H) bf16, hoisted once
    h = h0_ref[...].astype(jnp.float32)             # (Bp, H) f32 state

    # ---- Serial recurrence, fully unrolled at trace time.  xw never leaves
    # vregs; static slices -> no VMEM staging, no masked stores, no reloads.
    for t in range(S):
        pre = xw[t * Bp:(t + 1) * Bp, :] + jnp.dot(
            h.astype(wh.dtype), wh, preferred_element_type=jnp.float32)
        h = jnp.tanh(pre)                            # f32 elementwise

    # ---- Epilogue (runs once): h2o on final hidden state + softmax.
    logits = (jnp.dot(h.astype(wo_ref.dtype), wo_ref[...],
                      preferred_element_type=jnp.float32) + bo_ref[...])
    m = jnp.max(logits, axis=1, keepdims=True)
    e = jnp.exp(logits - m)
    denom = jnp.sum(e, axis=1, keepdims=True)
    out_ref[...] = (e * pl.reciprocal(denom, approx=True)).astype(out_ref.dtype)
    hT_ref[...] = h.astype(hT_ref.dtype)


def rnn_forward(x, h0, w_i2h, b_i2h, w_h2o, b_h2o,
                *, matmul_dtype=jnp.bfloat16):
    """x: (S, B, I); h0: (B, H); w_i2h: (H, I+H); b_i2h: (H,);
       w_h2o: (O, H); b_h2o: (O,). Returns (softmax_out (B, O), hidden (B, H))."""
    S, B, I = x.shape
    H = h0.shape[1]
    O = w_h2o.shape[0]

    # Pad batch to a sublane multiple (8) so every store/load is sublane-dense.
    Bp = max(8, ((B + 7) // 8) * 8)
    pad = Bp - B
    xp = jnp.pad(x, ((0, 0), (0, pad), (0, 0)))
    h0p = jnp.pad(h0, ((0, pad), (0, 0)))

    # Split the i2h weight into x-part and h-part (cat order is [x, h]),
    # pre-transpose for row-major matmuls, cast matmul operands to bf16.
    wx = jnp.transpose(w_i2h[:, :I]).astype(matmul_dtype)   # (I, H)
    wh = jnp.transpose(w_i2h[:, I:]).astype(matmul_dtype)   # (H, H)
    wo = jnp.transpose(w_h2o).astype(matmul_dtype)          # (H, O)
    bi = b_i2h.reshape(1, H).astype(jnp.float32)
    bo = b_h2o.reshape(1, O).astype(jnp.float32)
    x2d = xp.reshape(S * Bp, I).astype(matmul_dtype)         # (S*Bp, I)

    vmem = pl.BlockSpec(memory_space=pltpu.MemorySpace.VMEM)

    out, hT = pl.pallas_call(
        rnn_kernel,
        out_shape=(jax.ShapeDtypeStruct((Bp, O), x.dtype),
                   jax.ShapeDtypeStruct((Bp, H), x.dtype)),
        in_specs=[vmem] * 7,
        out_specs=(vmem, vmem),
    )(x2d, h0p, wx, wh, bi, wo, bo)

    return out[:B], hT[:B]


def xavier_uniform(key, shape):
    # nn.init.xavier_uniform_ for nn.Linear weight (out_features, in_features)
    fan_out, fan_in = shape
    bound = (6.0 / (fan_in + fan_out)) ** 0.5
    return jax.random.uniform(key, shape, jnp.float32, -bound, bound)


def rnn_reference(x, h0, w_i2h, b_i2h, w_h2o, b_h2o):
    # f32 reference with pinned HIGHEST matmul precision.
    S = x.shape[0]
    h = h0
    out = None
    for t in range(S):
        combined = jnp.concatenate([x[t], h], axis=1)
        h = jnp.tanh(jnp.dot(combined, w_i2h.T,
                             precision=lax.Precision.HIGHEST) + b_i2h)
        out = jnp.dot(h, w_h2o.T, precision=lax.Precision.HIGHEST) + b_h2o
    return jax.nn.softmax(out, axis=1), h


if __name__ == "__main__":
    # Small shapes consistent with the module's forward.
    seq_len, batch, input_size, hidden_size, output_size = 8, 2, 16, 32, 8

    key = jax.random.PRNGKey(0)
    k_x, k_w1, k_w2 = jax.random.split(key, 3)

    x = jax.random.normal(k_x, (seq_len, batch, input_size), jnp.float32)
    h0 = jnp.zeros((batch, hidden_size), jnp.float32)   # init_hidden()

    # Deterministic "init_weights": xavier_uniform for weights, zeros for biases.
    w_i2h = xavier_uniform(k_w1, (hidden_size, input_size + hidden_size))
    b_i2h = jnp.zeros((hidden_size,), jnp.float32)
    w_h2o = xavier_uniform(k_w2, (output_size, hidden_size))
    b_h2o = jnp.zeros((output_size,), jnp.float32)

    class_out, hidden = jax.jit(rnn_forward)(x, h0, w_i2h, b_i2h, w_h2o, b_h2o)
    jax.block_until_ready((class_out, hidden))

    ref_out, ref_h = rnn_reference(x, h0, w_i2h, b_i2h, w_h2o, b_h2o)
    assert class_out.shape == (batch, output_size)
    assert hidden.shape == (batch, hidden_size)
    # Tolerances account for bf16 matmul operands (f32 accumulation) and the
    # approximate reciprocal in the softmax epilogue.
    assert jnp.allclose(class_out, ref_out, atol=2e-2), (
        float(jnp.max(jnp.abs(class_out - ref_out))))
    assert jnp.allclose(hidden, ref_h, atol=5e-2), (
        float(jnp.max(jnp.abs(hidden - ref_h))))

    print("KERNEL_OK")
</pallas_src>

<mosaic_0001>
module attributes {stable_mosaic.version = 11 : i64} {
  func.func @rnn_kernel(%arg0: memref<64x16xbf16, #tpu.memory_space<vmem>>, %arg1: memref<8x32xf32, #tpu.memory_space<vmem>>, %arg2: memref<16x32xbf16, #tpu.memory_space<vmem>>, %arg3: memref<32x32xbf16, #tpu.memory_space<vmem>>, %arg4: memref<1x32xf32, #tpu.memory_space<vmem>>, %arg5: memref<32x8xbf16, #tpu.memory_space<vmem>>, %arg6: memref<1x8xf32, #tpu.memory_space<vmem>>, %arg7: memref<8x8xf32, #tpu.memory_space<vmem>>, %arg8: memref<8x32xf32, #tpu.memory_space<vmem>>) attributes {dimension_semantics = [], scalar_prefetch = 0 : i64, scratch_operands = 0 : i64, tpu.core_type = #tpu.core_type<tc>} {
    %c0 = arith.constant 0 : index
    %c0_0 = arith.constant 0 : index
    %0 = vector.load %arg0[%c0, %c0_0] : memref<64x16xbf16, #tpu.memory_space<vmem>>, vector<64x16xbf16>
    %c0_1 = arith.constant 0 : index
    %c0_2 = arith.constant 0 : index
    %1 = vector.load %arg2[%c0_1, %c0_2] : memref<16x32xbf16, #tpu.memory_space<vmem>>, vector<16x32xbf16>
    %cst = arith.constant dense<0.000000e+00> : vector<64x32xf32>
    %2 = tpu.matmul %0, %1, %cst {dimension_numbers = #tpu.dot_dimension_numbers<[1], [0], [0], [1], [0, 0, 1, 1], [], []>} : vector<64x16xbf16>, vector<16x32xbf16>, vector<64x32xf32> -> vector<64x32xf32>
    %c0_3 = arith.constant 0 : index
    %c0_4 = arith.constant 0 : index
    %3 = vector.load %arg4[%c0_3, %c0_4] : memref<1x32xf32, #tpu.memory_space<vmem>>, vector<1x32xf32>
    %4 = vector.broadcast %3 : vector<1x32xf32> to vector<64x32xf32>
    %5 = arith.addf %2, %4 : vector<64x32xf32>
    %c0_5 = arith.constant 0 : index
    %c0_6 = arith.constant 0 : index
    %6 = vector.load %arg3[%c0_5, %c0_6] : memref<32x32xbf16, #tpu.memory_space<vmem>>, vector<32x32xbf16>
    %c0_7 = arith.constant 0 : index
    %c0_8 = arith.constant 0 : index
    %7 = vector.load %arg1[%c0_7, %c0_8] : memref<8x32xf32, #tpu.memory_space<vmem>>, vector<8x32xf32>
    %8 = vector.extract_strided_slice %5 {offsets = [0, 0], sizes = [8, 32], strides = [1, 1]} : vector<64x32xf32> to vector<8x32xf32>
    %9 = arith.truncf %7 : vector<8x32xf32> to vector<8x32xbf16>
    %cst_9 = arith.constant dense<0.000000e+00> : vector<8x32xf32>
    %10 = tpu.matmul %9, %6, %cst_9 {dimension_numbers = #tpu.dot_dimension_numbers<[1], [0], [0], [1], [0, 0, 1, 1], [], []>} : vector<8x32xbf16>, vector<32x32xbf16>, vector<8x32xf32> -> vector<8x32xf32>
    %11 = arith.addf %8, %10 : vector<8x32xf32>
    %12 = math.tanh %11 : vector<8x32xf32>
    %13 = vector.extract_strided_slice %5 {offsets = [8, 0], sizes = [8, 32], strides = [1, 1]} : vector<64x32xf32> to vector<8x32xf32>
    %14 = arith.truncf %12 : vector<8x32xf32> to vector<8x32xbf16>
    %cst_10 = arith.constant dense<0.000000e+00> : vector<8x32xf32>
    %15 = tpu.matmul %14, %6, %cst_10 {dimension_numbers = #tpu.dot_dimension_numbers<[1], [0], [0], [1], [0, 0, 1, 1], [], []>} : vector<8x32xbf16>, vector<32x32xbf16>, vector<8x32xf32> -> vector<8x32xf32>
    %16 = arith.addf %13, %15 : vector<8x32xf32>
    %17 = math.tanh %16 : vector<8x32xf32>
    %18 = vector.extract_strided_slice %5 {offsets = [16, 0], sizes = [8, 32], strides = [1, 1]} : vector<64x32xf32> to vector<8x32xf32>
    %19 = arith.truncf %17 : vector<8x32xf32> to vector<8x32xbf16>
    %cst_11 = arith.constant dense<0.000000e+00> : vector<8x32xf32>
    %20 = tpu.matmul %19, %6, %cst_11 {dimension_numbers = #tpu.dot_dimension_numbers<[1], [0], [0], [1], [0, 0, 1, 1], [], []>} : vector<8x32xbf16>, vector<32x32xbf16>, vector<8x32xf32> -> vector<8x32xf32>
    %21 = arith.addf %18, %20 : vector<8x32xf32>
    %22 = math.tanh %21 : vector<8x32xf32>
    %23 = vector.extract_strided_slice %5 {offsets = [24, 0], sizes = [8, 32], strides = [1, 1]} : vector<64x32xf32> to vector<8x32xf32>
    %24 = arith.truncf %22 : vector<8x32xf32> to vector<8x32xbf16>
    %cst_12 = arith.constant dense<0.000000e+00> : vector<8x32xf32>
    %25 = tpu.matmul %24, %6, %cst_12 {dimension_numbers = #tpu.dot_dimension_numbers<[1], [0], [0], [1], [0, 0, 1, 1], [], []>} : vector<8x32xbf16>, vector<32x32xbf16>, vector<8x32xf32> -> vector<8x32xf32>
    %26 = arith.addf %23, %25 : vector<8x32xf32>
    %27 = math.tanh %26 : vector<8x32xf32>
    %28 = vector.extract_strided_slice %5 {offsets = [32, 0], sizes = [8, 32], strides = [1, 1]} : vector<64x32xf32> to vector<8x32xf32>
    %29 = arith.truncf %27 : vector<8x32xf32> to vector<8x32xbf16>
    %cst_13 = arith.constant dense<0.000000e+00> : vector<8x32xf32>
    %30 = tpu.matmul %29, %6, %cst_13 {dimension_numbers = #tpu.dot_dimension_numbers<[1], [0], [0], [1], [0, 0, 1, 1], [], []>} : vector<8x32xbf16>, vector<32x32xbf16>, vector<8x32xf32> -> vector<8x32xf32>
    %31 = arith.addf %28, %30 : vector<8x32xf32>
    %32 = math.tanh %31 : vector<8x32xf32>
    %33 = vector.extract_strided_slice %5 {offsets = [40, 0], sizes = [8, 32], strides = [1, 1]} : vector<64x32xf32> to vector<8x32xf32>
    %34 = arith.truncf %32 : vector<8x32xf32> to vector<8x32xbf16>
    %cst_14 = arith.constant dense<0.000000e+00> : vector<8x32xf32>
    %35 = tpu.matmul %34, %6, %cst_14 {dimension_numbers = #tpu.dot_dimension_numbers<[1], [0], [0], [1], [0, 0, 1, 1], [], []>} : vector<8x32xbf16>, vector<32x32xbf16>, vector<8x32xf32> -> vector<8x32xf32>
    %36 = arith.addf %33, %35 : vector<8x32xf32>
    %37 = math.tanh %36 : vector<8x32xf32>
    %38 = vector.extract_strided_slice %5 {offsets = [48, 0], sizes = [8, 32], strides = [1, 1]} : vector<64x32xf32> to vector<8x32xf32>
    %39 = arith.truncf %37 : vector<8x32xf32> to vector<8x32xbf16>
    %cst_15 = arith.constant dense<0.000000e+00> : vector<8x32xf32>
    %40 = tpu.matmul %39, %6, %cst_15 {dimension_numbers = #tpu.dot_dimension_numbers<[1], [0], [0], [1], [0, 0, 1, 1], [], []>} : vector<8x32xbf16>, vector<32x32xbf16>, vector<8x32xf32> -> vector<8x32xf32>
    %41 = arith.addf %38, %40 : vector<8x32xf32>
    %42 = math.tanh %41 : vector<8x32xf32>
    %43 = vector.extract_strided_slice %5 {offsets = [56, 0], sizes = [8, 32], strides = [1, 1]} : vector<64x32xf32> to vector<8x32xf32>
    %44 = arith.truncf %42 : vector<8x32xf32> to vector<8x32xbf16>
    %cst_16 = arith.constant dense<0.000000e+00> : vector<8x32xf32>
    %45 = tpu.matmul %44, %6, %cst_16 {dimension_numbers = #tpu.dot_dimension_numbers<[1], [0], [0], [1], [0, 0, 1, 1], [], []>} : vector<8x32xbf16>, vector<32x32xbf16>, vector<8x32xf32> -> vector<8x32xf32>
    %46 = arith.addf %43, %45 : vector<8x32xf32>
    %47 = math.tanh %46 : vector<8x32xf32>
    %48 = arith.truncf %47 : vector<8x32xf32> to vector<8x32xbf16>
    %c0_17 = arith.constant 0 : index
    %c0_18 = arith.constant 0 : index
    %49 = vector.load %arg5[%c0_17, %c0_18] : memref<32x8xbf16, #tpu.memory_space<vmem>>, vector<32x8xbf16>
    %cst_19 = arith.constant dense<0.000000e+00> : vector<8x8xf32>
    %50 = tpu.matmul %48, %49, %cst_19 {dimension_numbers = #tpu.dot_dimension_numbers<[1], [0], [0], [1], [0, 0, 1, 1], [], []>} : vector<8x32xbf16>, vector<32x8xbf16>, vector<8x8xf32> -> vector<8x8xf32>
    %c0_20 = arith.constant 0 : index
    %c0_21 = arith.constant 0 : index
    %51 = vector.load %arg6[%c0_20, %c0_21] : memref<1x8xf32, #tpu.memory_space<vmem>>, vector<1x8xf32>
    %52 = vector.broadcast %51 : vector<1x8xf32> to vector<8x8xf32>
    %53 = arith.addf %50, %52 : vector<8x8xf32>
    %cst_22 = arith.constant dense<0xFF800000> : vector<8xf32>
    %54 = vector.multi_reduction <maximumf>, %53, %cst_22 [1] : vector<8x8xf32> to vector<8xf32>
    %55 = vector.shape_cast %54 : vector<8xf32> to vector<8x1xf32>
    %56 = vector.broadcast %55 : vector<8x1xf32> to vector<8x8xf32>
    %57 = arith.subf %53, %56 : vector<8x8xf32>
    %58 = math.exp %57 : vector<8x8xf32>
    %cst_23 = arith.constant dense<0.000000e+00> : vector<8xf32>
    %59 = vector.multi_reduction <add>, %58, %cst_23 [1] : vector<8x8xf32> to vector<8xf32>
    %60 = vector.shape_cast %59 : vector<8xf32> to vector<8x1xf32>
    %61 = tpu.reciprocal %60 {approx = true} : vector<8x1xf32> -> vector<8x1xf32>
    %62 = vector.broadcast %61 : vector<8x1xf32> to vector<8x8xf32>
    %63 = arith.mulf %58, %62 : vector<8x8xf32>
    %c0_24 = arith.constant 0 : index
    %c0_25 = arith.constant 0 : index
    %64 = vector.load %arg7[%c0_24, %c0_25] : memref<8x8xf32, #tpu.memory_space<vmem>>, vector<8x8xf32>
    tpu.vector_store %arg7[%c0_24, %c0_25], %63 {strides = array<i32>} : memref<8x8xf32, #tpu.memory_space<vmem>>, vector<8x8xf32>,
    %c0_26 = arith.constant 0 : index
    %c0_27 = arith.constant 0 : index
    %65 = vector.load %arg8[%c0_26, %c0_27] : memref<8x32xf32, #tpu.memory_space<vmem>>, vector<8x32xf32>
    tpu.vector_store %arg8[%c0_26, %c0_27], %47 {strides = array<i32>} : memref<8x32xf32, #tpu.memory_space<vmem>>, vector<8x32xf32>,
    return
  }
}

</mosaic_0001>

<bundles_post_ra>
// kernel: rnn_forward.1
= control target key start
LH: loop header
LB: loop body
LE: loop exit
PB: predicated region body
PF: predicated region fallthrough
CT: control target
= control target key end

     0   :  { %v794_v0 = vmov 0.0   ;;  %vm795_vm0 = vmmov 0   ;;  %vm72_vm1 = vcmask 130048   ;;  %vm168_vm2 = vcmask 261120   ;;  %s969_s2 = inlined_call_operand.vmem [shape: bf16[16,32], index: 2, kind: input, shape index: {}]   ;;  %s970_s3 = inlined_call_operand.vmem [shape: bf16[32,32], index: 3, kind: input, shape index: {}]   ;;  %s971_s0 = inlined_call_operand.vmem [shape: bf16[64,16], index: 0, kind: input, shape index: {}]   ;;  %s972_s1 = inlined_call_operand.vmem [shape: f32[8,32], index: 1, kind: input, shape index: {}]   ;;  %s973_s4 = inlined_call_operand.vmem [shape: f32[1,32], index: 4, kind: input, shape index: {}]   ;;  %s974_s5 = inlined_call_operand.vmem [shape: bf16[32,8], index: 5, kind: input, shape index: {}]   ;;  %s975_s8 = inlined_call_operand.vmem [shape: f32[8,32], index: 8, kind: output, shape index: {1}]   ;;  %s976_s6 = inlined_call_operand.vmem [shape: f32[1,8], index: 6, kind: input, shape index: {}]   ;;  %s977_s7 = inlined_call_operand.vmem [shape: f32[8,8], index: 7, kind: output, shape index: {0}]  }
   0x1   :  { %691 = vmatprep.subr.bf16.mxu1 %v794_v0  ;;  %v765_v1 = vld [vmem:[%s969_s2] sm:$0xff]   ;;  %695 = vmatprep.mubr.msk.bf16.mxu1 %vm795_vm0, %v794_v0  ;;  %v850_v2 = vld [vmem:[%s970_s3 + $0x8] sm:$0xff]   ;;  %v770_v19 = vld [vmem:[%s971_s0 + $0x10] sm:$0xff]   ;;  %vm603_vm3 = vcmask 64512  }
   0x2   :  { %681 = vmatprep.subr.bf16.mxu0 %v765_v1  ;;  %v767_v3 = vld [vmem:[%s971_s0] sm:$0xff]   ;;  %692 = vmatpush3.bf16.msra.mxu1 %v850_v2  ;;  %v768_v4 = vld [vmem:[%s971_s0 + $0x8] sm:$0xff]   ;;  %v771_v20 = vld [vmem:[%s971_s0 + $0x18] sm:$0xff]  }
   0x3   :  { %682 = vmatpush3.bf16.msra.mxu0 %v765_v1  ;;  %683 = vmatprep.mubr.msk.bf16.mxu0 %vm72_vm1, %v767_v3  ;;  %v864_v5 = vld [vmem:[%s970_s3] sm:$0xff]  }
   0x4   :  { %693 = vmatprep.subr.bf16.mxu1 %v794_v0  ;;  %v154_v6 = vld [vmem:[%s972_s1] sm:$0xff]  ;;  %707 = vmatprep.subr.bf16.mxu0 %v794_v0 }
   0x5   :  { %v155_v7 = vpack.c.bf16 %v154_v6, %v154_v6  ;;  %v887_v9 = vld [vmem:[%s973_s4] ss:$0 sm:$0xff] }
   0x6   :  { %684 = vmatmul.mubr.msk.bf16.vlgmr.msra.gmra.mxu0 %vm72_vm1, %v768_v4  ;;  %694 = vmatpush3.bf16.msra.mxu1 %v864_v5 }
   0x7   :  { %708 = vmatpush3.bf16.msra.mxu0 %v850_v2  ;;  %699 = vmatprep.subr.bf16.mxu1 %v794_v0 }
   0x8   :  { %709 = vmatprep.subr.bf16.mxu0 %v794_v0  ;;  %687 = vmatprep.mubr.msk.bf16.mxu0 %vm72_vm1, %v770_v19 }
   0x9   :  { %696 = vmatmul.mubr.msk.bf16.vlgmr.msra.gmra.mxu1 %vm168_vm2, %v155_v7 }
   0xa   :  { %700 = vmatpush3.bf16.msra.mxu1 %v850_v2  ;;  %703 = vmatprep.mubr.msk.bf16.mxu1 %vm795_vm0, %v794_v0 }
   0xb   :  { %701 = vmatprep.subr.bf16.mxu1 %v794_v0  ;;  %710 = vmatpush3.bf16.msra.mxu0 %v864_v5 }
   0xc   :  { %723 = vmatprep.subr.bf16.mxu0 %v794_v0 }
   0xe   :  { %702 = vmatpush3.bf16.msra.mxu1 %v864_v5  ;;  %688 = vmatmul.mubr.msk.bf16.gmra.mxu0 %vm72_vm1, %v771_v20 }
   0xf   :  { %715 = vmatprep.subr.bf16.mxu1 %v794_v0  ;;  %711 = vmatprep.mubr.msk.bf16.mxu0 %vm795_vm0, %v794_v0 }
  0xc6   :  { %v685_v8 = vpop.f32.mrf.mxu0 }
  0xc7   :  { %v128_v35 = vadd.f32 %v685_v8, %v887_v9 }
  0xc8   :  { %v119_v10 = vpop.f32.mrf.mxu0 }
  0xc9   :  { %v120_v11 = vadd.f32 %v887_v9, %v119_v10  ;;  %v206_v12 = vpop.f32.mrf.mxu1 }
  0xca   :  { %v686_v21 = vpop.f32.mrf.mxu0 }
  0xcb   :  { %v212_v13 = vadd.f32 %v206_v12, %v120_v11  ;;  %v697_v14 = vpop.f32.mrf.mxu1  ;;  %v131_v43 = vadd.f32 %v686_v21, %v887_v9 }
  0xcc   :  { %v122_v22 = vpop.f32.mrf.mxu0  ;;  %v773_v14 = vld [vmem:[%s974_s5] sm:$0xff]  }
  0xcd   :  { %774 = vtanh.f32 %v212_v13  ;;  %v209_v15 = vpop.f32.mrf.mxu1  ;;  %v123_v23 = vadd.f32 %v887_v9, %v122_v22  ;;  %v772_v13 = vld [vmem:[%s974_s5 + $0x8] sm:$0xff]   ;;  %v645_v22 = vld [vmem:[%s976_s6] ss:$0 sm:$0xff] }
  0xce   :  { %v689_v31 = vpop.f32.mrf.mxu0 }
  0xcf   :  { %v698_v16 = vpop.f32.mrf.mxu1 }
  0xd0   :  { %v135_v32 = vpop.f32.mrf.mxu0 }
  0xd1   :  { %v136_v51 = vadd.f32 %v887_v9, %v135_v32 }
  0xd2   :  { %v915_v33 = vpop.f32.mrf.mxu0 }
  0xd3   :  { %v147_v15 = vadd.f32 %v915_v33, %v887_v9 }
  0xd4   :  { %v138_v34 = vpop.f32.mrf.mxu0 }
  0xd5   :  { %v139_v59 = vadd.f32 %v887_v9, %v138_v34 }
  0xda   :  { %v775_v17 = vpop.eup %774 }
  0xdb   :  { %v214_v18 = vpack.c.bf16 %v775_v17, %v775_v17 }
  0xdd   :  { %704 = vmatmul.mubr.msk.bf16.vlgmr.msra.gmra.mxu1 %vm168_vm2, %v214_v18 }
  0xde   :  { %716 = vmatpush3.bf16.msra.mxu1 %v850_v2  ;;  %719 = vmatprep.mubr.msk.bf16.mxu1 %vm795_vm0, %v794_v0 }
  0xdf   :  { %717 = vmatprep.subr.bf16.mxu1 %v794_v0 }
  0xe2   :  { %718 = vmatpush3.bf16.msra.mxu1 %v864_v5 }
  0xe3   :  { %731 = vmatprep.subr.bf16.mxu1 %v794_v0 }
 0x19d   :  { %v252_v24 = vpop.f32.mrf.mxu1 }
 0x19e   :  { %v258_v25 = vadd.f32 %v252_v24, %v123_v23 }
 0x19f   :  { %v705_v26 = vpop.f32.mrf.mxu1 }
 0x1a0   :  { %776 = vtanh.f32 %v258_v25 }
 0x1a1   :  { %v255_v27 = vpop.f32.mrf.mxu1 }
 0x1a3   :  { %v706_v28 = vpop.f32.mrf.mxu1 }
 0x1ad   :  { %v777_v29 = vpop.eup %776 }
 0x1ae   :  { %v260_v30 = vpack.c.bf16 %v777_v29, %v777_v29 }
 0x1b0   :  { %712 = vmatmul.mubr.msk.bf16.vlgmr.msra.gmra.mxu0 %vm168_vm2, %v260_v30 }
 0x1b1   :  { %724 = vmatpush3.bf16.msra.mxu0 %v850_v2  ;;  %727 = vmatprep.mubr.msk.bf16.mxu0 %vm795_vm0, %v794_v0 }
 0x1b2   :  { %725 = vmatprep.subr.bf16.mxu0 %v794_v0 }
 0x1b5   :  { %726 = vmatpush3.bf16.msra.mxu0 %v864_v5 }
 0x1b6   :  { %739 = vmatprep.subr.bf16.mxu0 %v794_v0 }
 0x270   :  { %v298_v36 = vpop.f32.mrf.mxu0 }
 0x271   :  { %v304_v37 = vadd.f32 %v298_v36, %v128_v35 }
 0x272   :  { %v713_v38 = vpop.f32.mrf.mxu0 }
 0x273   :  { %778 = vtanh.f32 %v304_v37 }
 0x274   :  { %v301_v39 = vpop.f32.mrf.mxu0 }
 0x276   :  { %v714_v40 = vpop.f32.mrf.mxu0 }
 0x280   :  { %v779_v41 = vpop.eup %778 }
 0x281   :  { %v306_v42 = vpack.c.bf16 %v779_v41, %v779_v41 }
 0x283   :  { %720 = vmatmul.mubr.msk.bf16.vlgmr.msra.gmra.mxu1 %vm168_vm2, %v306_v42 }
 0x284   :  { %732 = vmatpush3.bf16.msra.mxu1 %v850_v2  ;;  %735 = vmatprep.mubr.msk.bf16.mxu1 %vm795_vm0, %v794_v0 }
 0x285   :  { %733 = vmatprep.subr.bf16.mxu1 %v794_v0 }
 0x288   :  { %734 = vmatpush3.bf16.msra.mxu1 %v864_v5 }
 0x289   :  { %747 = vmatprep.subr.bf16.mxu1 %v794_v0 }
 0x343   :  { %v344_v44 = vpop.f32.mrf.mxu1 }
 0x344   :  { %v350_v45 = vadd.f32 %v344_v44, %v131_v43 }
 0x345   :  { %v721_v46 = vpop.f32.mrf.mxu1 }
 0x346   :  { %780 = vtanh.f32 %v350_v45 }
 0x347   :  { %v347_v47 = vpop.f32.mrf.mxu1 }
 0x349   :  { %v722_v48 = vpop.f32.mrf.mxu1 }
 0x353   :  { %v781_v49 = vpop.eup %780 }
 0x354   :  { %v352_v50 = vpack.c.bf16 %v781_v49, %v781_v49 }
 0x356   :  { %728 = vmatmul.mubr.msk.bf16.vlgmr.msra.gmra.mxu0 %vm168_vm2, %v352_v50 }
 0x357   :  { %740 = vmatpush3.bf16.msra.mxu0 %v850_v2  ;;  %743 = vmatprep.mubr.msk.bf16.mxu0 %vm795_vm0, %v794_v0 }
 0x358   :  { %741 = vmatprep.subr.bf16.mxu0 %v794_v0 }
 0x35b   :  { %742 = vmatpush3.bf16.msra.mxu0 %v864_v5 }
 0x35c   :  { %755 = vmatprep.subr.bf16.mxu0 %v794_v0 }
 0x416   :  { %v390_v52 = vpop.f32.mrf.mxu0 }
 0x417   :  { %v396_v53 = vadd.f32 %v390_v52, %v136_v51 }
 0x418   :  { %v729_v54 = vpop.f32.mrf.mxu0 }
 0x419   :  { %782 = vtanh.f32 %v396_v53 }
 0x41a   :  { %v393_v55 = vpop.f32.mrf.mxu0 }
 0x41c   :  { %v730_v56 = vpop.f32.mrf.mxu0 }
 0x426   :  { %v783_v57 = vpop.eup %782 }
 0x427   :  { %v398_v58 = vpack.c.bf16 %v783_v57, %v783_v57 }
 0x429   :  { %736 = vmatmul.mubr.msk.bf16.vlgmr.msra.gmra.mxu1 %vm168_vm2, %v398_v58 }
 0x42a   :  { %748 = vmatpush3.bf16.msra.mxu1 %v850_v2  ;;  %751 = vmatprep.mubr.msk.bf16.mxu1 %vm795_vm0, %v794_v0  ;;  %v144_v2 = vadd.f32 %v689_v31, %v887_v9 }
 0x42b   :  { %749 = vmatprep.subr.bf16.mxu1 %v794_v0 }
 0x42e   :  { %750 = vmatpush3.bf16.msra.mxu1 %v864_v5 }
 0x4e9   :  { %v436_v60 = vpop.f32.mrf.mxu1 }
 0x4ea   :  { %v442_v61 = vadd.f32 %v436_v60, %v139_v59 }
 0x4eb   :  { %v737_v62 = vpop.f32.mrf.mxu1 }
 0x4ec   :  { %784 = vtanh.f32 %v442_v61 }
 0x4ed   :  { %v439_v63 = vpop.f32.mrf.mxu1 }
 0x4ef   :  { %v738_v1 = vpop.f32.mrf.mxu1 }
 0x4f9   :  { %v785_v3 = vpop.eup %784 }
 0x4fa   :  { %v444_v4 = vpack.c.bf16 %v785_v3, %v785_v3 }
 0x4fc   :  { %744 = vmatmul.mubr.msk.bf16.vlgmr.msra.gmra.mxu0 %vm168_vm2, %v444_v4 }
 0x4fd   :  { %759 = vmatprep.mubr.msk.bf16.mxu0 %vm795_vm0, %v794_v0  ;;  %756 = vmatpush3.bf16.msra.mxu0 %v772_v13 }
 0x4fe   :  { %757 = vmatprep.subr.bf16.mxu0 %v794_v0 }
 0x501   :  { %758 = vmatpush3.bf16.msra.mxu0 %v773_v14 }
 0x5bc   :  { %v482_v6 = vpop.f32.mrf.mxu0 }
 0x5bd   :  { %v488_v7 = vadd.f32 %v482_v6, %v144_v2 }
 0x5be   :  { %v745_v5 = vpop.f32.mrf.mxu0 }
 0x5bf   :  { %786 = vtanh.f32 %v488_v7 }
 0x5c0   :  { %v485_v8 = vpop.f32.mrf.mxu0 }
 0x5c2   :  { %v746_v10 = vpop.f32.mrf.mxu0 }
 0x5cc   :  { %v787_v11 = vpop.eup %786 }
 0x5cd   :  { %v490_v12 = vpack.c.bf16 %v787_v11, %v787_v11 }
 0x5cf   :  { %752 = vmatmul.mubr.msk.bf16.vlgmr.msra.gmra.mxu1 %vm168_vm2, %v490_v12 }
 0x68f   :  { %v528_v16 = vpop.f32.mrf.mxu1 }
 0x690   :  { %v534_v17 = vadd.f32 %v528_v16, %v147_v15 }
 0x691   :  { %v753_v18 = vpop.f32.mrf.mxu1 }
 0x692   :  { %788 = vtanh.f32 %v534_v17 }
 0x693   :  { %v531_v19 = vpop.f32.mrf.mxu1 }
 0x695   :  { %v754_v20 = vpop.f32.mrf.mxu1 }
 0x69f   :  { %v789_v21 = vpop.eup %788 }
 0x6a0   :  { %616 = vst.msk [vmem:[%s975_s8] sm:$0xff] %vm168_vm2, %v789_v21  ;;  %v536_v0 = vpack.c.bf16 %v789_v21, %v789_v21 }
 0x6a2   :  { %760 = vmatmul.mubr.msk.bf16.vlgmr.msra.gmra.mxu0 %vm168_vm2, %v536_v0 }
 0x762   :  { %v597_v9 = vpop.f32.mrf.mxu0 }
 0x763   :  { %v598_v23 = vadd.f32 %v645_v22, %v597_v9 }
 0x764   :  { %v761_v24 = vpop.f32.mrf.mxu0 }
 0x765   :  { %v604_v25 = vsel %vm603_vm3, %v598_v23, -inf }
 0x766   :  { %605 = vmax.xlane.f32.xlu0 %v604_v25  ;;  %v600_v26 = vpop.f32.mrf.mxu0 }
 0x768   :  { %v762_v27 = vpop.f32.mrf.mxu0 }
 0x7ef   :  { %v606_v28 = vpop.xlane.xlu0 %605 }
 0x7f0   :  { %v607_v29 = vsub.f32 %v598_v23, %v606_v28 }
 0x7f2   :  { %v608_v30 = vmul.f32 1.442695, %v607_v29 }
 0x7f4   :  { %790 = vpow2.f32 %v608_v30 }
 0x801   :  { %v791_v31 = vpop.eup %790 }
 0x802   :  { %v610_v32 = vsel %vm603_vm3, %v791_v31, 0.0 }
 0x803   :  { %611 = vadd.xlane.f32.xlu0 %v610_v32 }
 0x88c   :  { %v612_v33 = vpop.xlane.xlu0 %611 }
 0x88d   :  { %792 = vrcp.f32 %v612_v33 }
 0x89a   :  { %v793_v34 = vpop.eup %792 }
 0x89b   :  { %v614_v35 = vmul.f32 %v793_v34, %v791_v31 }
 0x89d   :  { %615 = vst.msk [vmem:[%s977_s7] sm:$0xff] %vm603_vm3, %v614_v35 }

</bundles_post_ra>
